<compile_context>
chip_gen: v5e
topology: v5e:2x2
jax: 0.10.0
libtpu: 0.0.40
codegen_flags: <defaults>
</compile_context>

<pallas_src>
import functools

import jax
import jax.numpy as jnp
from jax import lax
from jax.experimental import pallas as pl
from jax.experimental.pallas import tpu as pltpu

TEMPERATURE = 0.07
BASE_TEMPERATURE = 0.07
_NORM_EPS = 1e-12  # torch.nn.functional.normalize default eps


def _round_up(x, m):
    return (x + m - 1) // m * m


# ---------------------------------------------------------------------------
# Prep pass: L2-normalize each row, fold 1/temperature into the sketch half.
# ---------------------------------------------------------------------------
def _normalize_kernel(sk_ref, sh_ref, sk_out, sh_out, *, inv_temp):
    def _norm(x, scale):
        x = x.astype(jnp.float32)
        sumsq = jnp.sum(x * x, axis=1, keepdims=True)
        # clamping sum-of-squares at eps^2 == clamping the norm at eps
        inv = lax.rsqrt(jnp.maximum(sumsq, _NORM_EPS * _NORM_EPS))
        return x * (inv * scale)

    sk_out[...] = _norm(sk_ref[...], inv_temp).astype(sk_out.dtype)
    sh_out[...] = _norm(sh_ref[...], 1.0).astype(sh_out.dtype)


# ---------------------------------------------------------------------------
# Main pass: flash-style online softmax denominator + diagonal logit per row.
# ---------------------------------------------------------------------------
def _loss_tile_kernel(sk_ref, sh_ref, out_ref, m_ref, l_ref, d_ref, *,
                      tile, mini, n_col, has_col_pad):
    i = pl.program_id(0)          # row tile (sketches)  -- "parallel"
    j = pl.program_id(1)          # col tile (shapes)    -- reduction, last

    @pl.when(j == 0)
    def _():
        m_ref[...] = jnp.full_like(m_ref, -jnp.inf)
        l_ref[...] = jnp.zeros_like(l_ref)
        d_ref[...] = jnp.zeros_like(d_ref)

    # Similarity tile: contract the LAST dim of both operands (no explicit
    # transpose of the shapes tile feeding the MXU).
    # TODO(synk): confirm in the Mosaic dump that this contraction lowers
    # without a vxpose; if not, pre-transpose shapes to [D, mini] in the
    # wrapper and contract (1,)(0,) instead.
    s = lax.dot_general(
        sk_ref[...], sh_ref[...],
        dimension_numbers=(((1,), (1,)), ((), ())),
        preferred_element_type=jnp.float32)                     # [tile, tile]

    m_prev = m_ref[...]
    m_new = jnp.maximum(m_prev, jnp.max(s, axis=1, keepdims=True))
    alpha = jnp.exp(m_prev - m_new)
    carry = alpha * l_ref[...]
    m_ref[...] = m_new

    def _exp_masked(shift, diag_mask=None):
        p = jnp.exp(shift)
        if diag_mask is not None:
            p = jnp.where(diag_mask, 0.0, p)
        if has_col_pad:            # Python-static: only when mini % tile != 0
            cols = lax.broadcasted_iota(jnp.int32, (tile, tile), 1)
            p = jnp.where(cols < (mini - j * tile), p, 0.0)
        return p

    @pl.when(i != j)
    def _():                       # off-diagonal tiles: exp + row-sum only
        p = _exp_masked(s - m_new)
        l_ref[...] = carry + jnp.sum(p, axis=1, keepdims=True)

    @pl.when(i == j)
    def _():                       # diagonal tiles: mask diag, grab diag(total)
        rows = lax.broadcasted_iota(jnp.int32, (tile, tile), 0)
        cols = lax.broadcasted_iota(jnp.int32, (tile, tile), 1)
        on_diag = rows == cols
        p = _exp_masked(s - m_new, diag_mask=on_diag)
        l_ref[...] = carry + jnp.sum(p, axis=1, keepdims=True)
        # diag(total) from the same MXU values used for the denominator.
        d_ref[...] = jnp.sum(jnp.where(on_diag, s, 0.0), axis=1, keepdims=True)

    @pl.when(j == n_col - 1)
    def _():
        # log_prob_pos = (total_ii - m) - log(sum_{k != i} exp(total_ik - m))
        out_ref[...] = (d_ref[...] - m_ref[...]) - jnp.log(l_ref[...])


def contrastive_loss(embeddings, xyz=None, *, temperature=TEMPERATURE,
                     base_temperature=BASE_TEMPERATURE, tile_size=256):
    """embeddings: [B, D] float. Returns shape (1,) float32 (== torch .mean(0))."""
    del xyz  # unused by the PyTorch forward
    B, D = embeddings.shape
    assert B % 2 == 0, "batch must be even (split into sketches / shapes)"
    mini = B // 2

    tile = _round_up(min(tile_size, _round_up(mini, 8)), 8)
    mini_p = _round_up(mini, tile)
    n_tiles = mini_p // tile
    has_pad = mini_p != mini

    # bf16 MXU operands (f32 accumulation) only pay off once the matmul, not
    # the single-slot EUP exp, is the binding unit (roughly D >= 256).
    compute_dtype = jnp.bfloat16 if D >= 256 else jnp.float32

    sketchs = embeddings[:mini].astype(jnp.float32)
    shapes_ = embeddings[mini:].astype(jnp.float32)
    if has_pad:
        pad = mini_p - mini
        sketchs = jnp.pad(sketchs, ((0, pad), (0, 0)))
        shapes_ = jnp.pad(shapes_, ((0, pad), (0, 0)))

    # ---- prep pass (normalization hoisted out of the inner tile loop) ------
    sk_s, sh_s = pl.pallas_call(
        functools.partial(_normalize_kernel, inv_temp=1.0 / temperature),
        out_shape=(jax.ShapeDtypeStruct((mini_p, D), compute_dtype),
                   jax.ShapeDtypeStruct((mini_p, D), compute_dtype)),
        grid_spec=pltpu.PrefetchScalarGridSpec(
            num_scalar_prefetch=0,
            grid=(n_tiles,),
            in_specs=[pl.BlockSpec((tile, D), lambda r: (r, 0)),
                      pl.BlockSpec((tile, D), lambda r: (r, 0))],
            out_specs=[pl.BlockSpec((tile, D), lambda r: (r, 0)),
                       pl.BlockSpec((tile, D), lambda r: (r, 0))]),
        compiler_params=pltpu.CompilerParams(
            dimension_semantics=("parallel",)),
    )(sketchs, shapes_)

    # ---- main pass ----------------------------------------------------------
    itemsize = jnp.dtype(compute_dtype).itemsize
    vmem_est = (2 * 2 * tile * D * itemsize      # double-buffered input tiles
                + 8 * tile * tile * 4            # live [tile, tile] temporaries
                + (1 << 20))
    vmem_limit = int(min(max(2 * vmem_est, 16 << 20), 60 << 20))

    cost = pl.CostEstimate(
        flops=2 * mini_p * mini_p * D,
        transcendentals=mini_p * mini_p + 2 * mini_p,
        bytes_accessed=(n_tiles + 1) * mini_p * D * itemsize + mini_p * 4)

    log_prob = pl.pallas_call(
        functools.partial(_loss_tile_kernel, tile=tile, mini=mini,
                          n_col=n_tiles, has_col_pad=has_pad),
        out_shape=jax.ShapeDtypeStruct((mini_p, 1), jnp.float32),
        grid_spec=pltpu.PrefetchScalarGridSpec(
            num_scalar_prefetch=0,
            grid=(n_tiles, n_tiles),                     # reduction axis last
            in_specs=[pl.BlockSpec((tile, D), lambda i, j: (i, 0)),
                      pl.BlockSpec((tile, D), lambda i, j: (j, 0))],
            out_specs=pl.BlockSpec((tile, 1), lambda i, j: (i, 0)),
            scratch_shapes=[pltpu.VMEM((tile, 1), jnp.float32),    # running max
                            pltpu.VMEM((tile, 1), jnp.float32),    # running sum
                            pltpu.VMEM((tile, 1), jnp.float32)]),  # diag(total)
        compiler_params=pltpu.CompilerParams(
            dimension_semantics=("parallel", "arbitrary"),
            vmem_limit_bytes=vmem_limit),
        cost_estimate=cost,
    )(sk_s, sh_s)

    # Per-row partial results reduced in the wrapper (keeps row tiles
    # independent across TensorCores on v7x); padded rows sliced away.
    mean_log_prob_pos = jnp.mean(log_prob[:mini, 0])
    nce = -(temperature / base_temperature) * mean_log_prob_pos
    return nce.reshape((1,))


def _reference(embeddings, temperature=TEMPERATURE,
               base_temperature=BASE_TEMPERATURE):
    # Pure-JAX mirror of the PyTorch forward, for sanity checking.
    x = embeddings.astype(jnp.float32)
    norm = jnp.maximum(jnp.sqrt(jnp.sum(x * x, axis=1, keepdims=True)), _NORM_EPS)
    xn = x / norm
    mini = x.shape[0] // 2
    sketchs, shapes_ = xn[:mini], xn[mini:]
    total = (sketchs @ shapes_.T) / temperature
    logits = total - jnp.max(total, axis=1, keepdims=True)
    mask = jnp.ones((mini, mini)) - jnp.eye(mini)
    exp_logits = jnp.exp(logits) * mask
    log_prob_pos = jnp.diag(logits).reshape(-1, 1) - jnp.log(
        jnp.sum(exp_logits, axis=1, keepdims=True))
    mean_log_prob_pos = jnp.mean(log_prob_pos, axis=0)
    return -(temperature / base_temperature) * mean_log_prob_pos


if __name__ == "__main__":
    key = jax.random.PRNGKey(0)
    k1, k2 = jax.random.split(key)

    # Demo shape: batch of 8 embeddings (4 sketches + 4 shapes), hidden dim 32.
    B, D = 8, 32
    embeddings = jax.random.normal(k1, (B, D), dtype=jnp.float32)
    xyz = None  # unused by the PyTorch forward, kept for signature parity

    nce = contrastive_loss(embeddings, xyz)
    jax.block_until_ready(nce)
    ref = _reference(embeddings)
    assert nce.shape == (1,)
    assert jnp.allclose(nce, ref, atol=1e-4, rtol=1e-4), (nce, ref)

    # Also exercise the multi-tile online-softmax path (2x2 grid, off-diagonal
    # tiles, row/col padding) by forcing a deliberately small tile size.
    emb2 = jax.random.normal(k2, (24, 32), dtype=jnp.float32)
    nce2 = contrastive_loss(emb2, None, tile_size=8)
    jax.block_until_ready(nce2)
    ref2 = _reference(emb2)
    assert jnp.allclose(nce2, ref2, atol=1e-4, rtol=1e-4), (nce2, ref2)

    print("KERNEL_OK")
</pallas_src>

<mosaic_0001>
module attributes {stable_mosaic.version = 11 : i64} {
  func.func @_normalize_kernel(%arg0: i32, %arg1: memref<8x32xf32, #tpu.memory_space<vmem>>, %arg2: memref<8x32xf32, #tpu.memory_space<vmem>>, %arg3: memref<8x32xf32, #tpu.memory_space<vmem>>, %arg4: memref<8x32xf32, #tpu.memory_space<vmem>>) attributes {dimension_semantics = [#tpu.dimension_semantics<parallel>], iteration_bounds = array<i64: 1>, scalar_prefetch = 0 : i64, scratch_operands = 0 : i64, tpu.core_type = #tpu.core_type<tc>, window_params = [{transform_indices = @transform_0, window_bounds = array<i64: 8, 32>}, {transform_indices = @transform_1, window_bounds = array<i64: 8, 32>}, {transform_indices = @transform_2, window_bounds = array<i64: 8, 32>}, {transform_indices = @transform_3, window_bounds = array<i64: 8, 32>}]} {
    %c0 = arith.constant 0 : index
    %c0_0 = arith.constant 0 : index
    %0 = vector.load %arg1[%c0, %c0_0] : memref<8x32xf32, #tpu.memory_space<vmem>>, vector<8x32xf32>
    %1 = arith.mulf %0, %0 : vector<8x32xf32>
    %cst = arith.constant dense<0.000000e+00> : vector<8xf32>
    %2 = vector.multi_reduction <add>, %1, %cst [1] : vector<8x32xf32> to vector<8xf32>
    %3 = vector.shape_cast %2 : vector<8xf32> to vector<8x1xf32>
    %cst_1 = arith.constant 1.000000e-24 : f32
    %4 = vector.broadcast %cst_1 : f32 to vector<8x1xf32>
    %5 = arith.maximumf %3, %4 : vector<8x1xf32>
    %6 = math.rsqrt %5 : vector<8x1xf32>
    %cst_2 = arith.constant 14.2857141 : f32
    %7 = vector.broadcast %cst_2 : f32 to vector<8x1xf32>
    %8 = arith.mulf %6, %7 : vector<8x1xf32>
    %9 = vector.broadcast %8 : vector<8x1xf32> to vector<8x32xf32>
    %10 = arith.mulf %0, %9 : vector<8x32xf32>
    %c0_3 = arith.constant 0 : index
    %c0_4 = arith.constant 0 : index
    %11 = vector.load %arg3[%c0_3, %c0_4] : memref<8x32xf32, #tpu.memory_space<vmem>>, vector<8x32xf32>
    tpu.vector_store %arg3[%c0_3, %c0_4], %10 {strides = array<i32>} : memref<8x32xf32, #tpu.memory_space<vmem>>, vector<8x32xf32>,
    %c0_5 = arith.constant 0 : index
    %c0_6 = arith.constant 0 : index
    %12 = vector.load %arg2[%c0_5, %c0_6] : memref<8x32xf32, #tpu.memory_space<vmem>>, vector<8x32xf32>
    %13 = arith.mulf %12, %12 : vector<8x32xf32>
    %cst_7 = arith.constant dense<0.000000e+00> : vector<8xf32>
    %14 = vector.multi_reduction <add>, %13, %cst_7 [1] : vector<8x32xf32> to vector<8xf32>
    %15 = vector.shape_cast %14 : vector<8xf32> to vector<8x1xf32>
    %cst_8 = arith.constant 1.000000e-24 : f32
    %16 = vector.broadcast %cst_8 : f32 to vector<8x1xf32>
    %17 = arith.maximumf %15, %16 : vector<8x1xf32>
    %18 = math.rsqrt %17 : vector<8x1xf32>
    %cst_9 = arith.constant 1.000000e+00 : f32
    %19 = vector.broadcast %cst_9 : f32 to vector<8x1xf32>
    %20 = arith.mulf %18, %19 : vector<8x1xf32>
    %21 = vector.broadcast %20 : vector<8x1xf32> to vector<8x32xf32>
    %22 = arith.mulf %12, %21 : vector<8x32xf32>
    %c0_10 = arith.constant 0 : index
    %c0_11 = arith.constant 0 : index
    %23 = vector.load %arg4[%c0_10, %c0_11] : memref<8x32xf32, #tpu.memory_space<vmem>>, vector<8x32xf32>
    tpu.vector_store %arg4[%c0_10, %c0_11], %22 {strides = array<i32>} : memref<8x32xf32, #tpu.memory_space<vmem>>, vector<8x32xf32>,
    return
  }
  func.func @transform_0(%arg0: i32) -> (i32, i32) {
    %c0_i32 = arith.constant 0 : i32
    %c0_i32_0 = arith.constant 0 : i32
    return %arg0, %c0_i32 : i32, i32
  }
  func.func @transform_1(%arg0: i32) -> (i32, i32) {
    %c0_i32 = arith.constant 0 : i32
    %c0_i32_0 = arith.constant 0 : i32
    return %arg0, %c0_i32 : i32, i32
  }
  func.func @transform_2(%arg0: i32) -> (i32, i32) {
    %c0_i32 = arith.constant 0 : i32
    %c0_i32_0 = arith.constant 0 : i32
    return %arg0, %c0_i32 : i32, i32
  }
  func.func @transform_3(%arg0: i32) -> (i32, i32) {
    %c0_i32 = arith.constant 0 : i32
    %c0_i32_0 = arith.constant 0 : i32
    return %arg0, %c0_i32 : i32, i32
  }
}

</mosaic_0001>

<bundles_post_ra>
// kernel: tpu_custom_call.1
= control target key start
LH: loop header
LB: loop body
LE: loop exit
PB: predicated region body
PF: predicated region fallthrough
CT: control target
= control target key end

     0   :  { %9 = vsyncpa [#allocation3], 0  ;;  %s267_s0 = inlined_call_operand.hbm [shape: f32[8,32], index: 0, kind: input, shape index: {}]   ;;  %s268_s1 = inlined_call_operand.hbm [shape: f32[8,32], index: 1, kind: input, shape index: {}]   ;;  %s269_s2 = inlined_call_operand.hbm [shape: f32[8,32], index: 2, kind: output, shape index: {0}]   ;;  %s270_s3 = inlined_call_operand.hbm [shape: f32[8,32], index: 3, kind: output, shape index: {1}]  }
   0x1   :  { %10 = vsyncpa [#allocation6], 0 }
   0x2   :  { %11 = vsyncpa [#allocation4], 0 }
   0x3   :  { %12 = vsyncpa [#allocation9], 0  ;;  %s18_s14 = sshll.u32 %s267_s0, 4  ;;  %s227_s15 = smov [#allocation2]   ;;  %s19_s14 = int_to_ptr.hbm [resolvable:$true] %s18_s14 }
   0x4   :  { %s20_s16 = sshll.u32 %s227_s15, 4  ;;  %s29_s19 = sshll.u32 %s268_s1, 4  ;;  %s21_s16 = int_to_ptr.vmem [resolvable:$true] %s20_s16  ;;  %s30_s19 = int_to_ptr.hbm [resolvable:$true] %s29_s19 }
   0x5   :  { %23 = dma.hbm_to_vmem [thread:$0]  %s19_s14, 128, %s21_s16, [#allocation3]  }
   0x6   :  { %s228_s20 = smov [#allocation5]  }
   0x7   :  { %s31_s21 = sshll.u32 %s228_s20, 4  ;;  %s32_s21 = int_to_ptr.vmem [resolvable:$true] %s31_s21 }
   0x8   :  { %34 = dma.hbm_to_vmem [thread:$0]  %s30_s19, 128, %s32_s21, [#allocation6]  }
   0x9   :  { %219 = dma.done.wait [#allocation3], 128  }
   0xa   :  { %220 = vsyncadd [#allocation3], 4294967168 }
   0xb   :  { %221 = dma.done.wait [#allocation6], 128  }
   0xc   :  { %222 = vsyncadd [#allocation6], 4294967168  ;;  %v43_v0 = vld [vmem:[#allocation2] sm:$0xff]  ;;  %vm45_vm0 = vcmask 261120   ;;  %v63_v2 = vld [vmem:[#allocation5] sm:$0xff]  ;;  %s229_s0 = smov [#allocation7]  }
   0xd   :  { %v44_v1 = vmul.f32 %v43_v0, %v43_v0  ;;  %v64_v4 = vmul.f32 %v63_v2, %v63_v2  ;;  %s86_s1 = sshll.u32 %s229_s0, 4  ;;  %s88_s24 = sshll.u32 %s269_s2, 4  ;;  %s87_s1 = int_to_ptr.vmem [resolvable:$true] %s86_s1  ;;  %s89_s24 = int_to_ptr.hbm [resolvable:$true] %s88_s24 }
   0xe   :  { %s230_s25 = smov [#allocation8]   ;;  %s99_s29 = sshll.u32 %s270_s3, 4  ;;  %s100_s29 = int_to_ptr.hbm [resolvable:$true] %s99_s29 }
   0xf   :  { %v46_v3 = vsel %vm45_vm0, %v44_v1, 0.0  ;;  %v65_v5 = vsel %vm45_vm0, %v64_v4, 0.0  ;;  %s97_s26 = sshll.u32 %s230_s25, 4  ;;  %s98_s26 = int_to_ptr.vmem [resolvable:$true] %s97_s26 }
  0x10   :  { %47 = vadd.xlane.f32.xlu0 %v46_v3 }
  0x18   :  { %66 = vadd.xlane.f32.xlu0 %v65_v5 }
  0x83   :  { %v48_v6 = vpop.xlane.xlu0 %47 }
  0x84   :  { %v49_v7 = vmax.f32 %v48_v6, 1e-24 }
  0x86   :  { %119 = vrsqrt.f32 %v49_v7  ;;  %vm56_vm2 = vweird.f32 %v49_v7 }
  0x8b   :  { %v67_v8 = vpop.xlane.xlu0 %66 }
  0x8c   :  { %v120_v9 = vpop.eup %119  ;;  %v68_v10 = vmax.f32 %v67_v8, 1e-24 }
  0x8d   :  { %v51_v11 = vmul.f32 %v120_v9, %v49_v7  ;;  %vm57_vm1 = vweird.f32 %v120_v9 }
  0x8e   :  { %121 = vrsqrt.f32 %v68_v10  ;;  %vm58_vm3 = vmor %vm56_vm2, %vm57_vm1  ;;  %vm75_vm5 = vweird.f32 %v68_v10 }
  0x8f   :  { %v52_v12 = vmul.f32 %v120_v9, %v51_v11 }
  0x91   :  { %v53_v13 = vmul.f32 0.5, %v52_v12 }
  0x93   :  { %v54_v14 = vsub.f32 1.5, %v53_v13 }
  0x94   :  { %v122_v15 = vpop.eup %121 }
  0x95   :  { %v55_v16 = vmul.f32 %v120_v9, %v54_v14  ;;  %v70_v17 = vmul.f32 %v122_v15, %v68_v10  ;;  %vm76_vm4 = vweird.f32 %v122_v15 }
  0x96   :  { %vm77_vm6 = vmor %vm75_vm5, %vm76_vm4 }
  0x97   :  { %v59_v18 = vsel %vm58_vm3, %v120_v9, %v55_v16  ;;  %v71_v19 = vmul.f32 %v122_v15, %v70_v17 }
  0x98   :  { %v60_v20 = vmul.f32 14.285714, %v59_v18 }
  0x99   :  { %v72_v21 = vmul.f32 0.5, %v71_v19 }
  0x9a   :  { %v61_v22 = vmul.f32 %v60_v20, %v43_v0 }
  0x9b   :  { %v73_v23 = vsub.f32 1.5, %v72_v21 }
  0x9c   :  { %62 = vst.msk [vmem:[#allocation7] sm:$0xff] %vm45_vm0, %v61_v22 }
  0x9d   :  { %v74_v24 = vmul.f32 %v122_v15, %v73_v23  ;;  %91 = dma.vmem_to_hbm [thread:$0]  %s87_s1, 128, %s89_s24, [#allocation4]  }
  0x9f   :  { %v78_v25 = vsel %vm77_vm6, %v122_v15, %v74_v24 }
  0xa0   :  { %v79_v26 = vmul.f32 %v78_v25, %v63_v2 }
  0xa2   :  { %80 = vst.msk [vmem:[#allocation8] sm:$0xff] %vm45_vm0, %v79_v26 }
  0xa3   :  { %102 = dma.vmem_to_hbm [thread:$0]  %s98_s26, 128, %s100_s29, [#allocation9]  }
  0xa4   :  { %223 = dma.done.wait [#allocation4], 128  }
  0xa5   :  { %224 = vsyncadd [#allocation4], 4294967168 }
  0xa6   :  { %225 = dma.done.wait [#allocation9], 128  }
  0xa7   :  { %226 = vsyncadd [#allocation9], 4294967168 }
  0xa8   :  { %111 = vsyncpa [#allocation3], 1 }
  0xa9   :  { %112 = vsyncpa [#allocation6], 1 }
  0xaa   :  { %113 = vsyncpa [#allocation4], 1 }
  0xab   :  { %114 = vsyncpa [#allocation9], 1 }

</bundles_post_ra>
